<compile_context>
chip_gen: v7x
topology: tpu7x:2x2x1
jax: 0.10.0
libtpu: 0.0.40
codegen_flags: <defaults>
</compile_context>

<pallas_src>
import math
from functools import partial

import jax
import jax.numpy as jnp
from jax.experimental import pallas as pl
from jax.experimental.pallas import tpu as pltpu


# ----------------------------------------------------------------------------
# helpers
# ----------------------------------------------------------------------------
def _row_tile(n, max_tile=512):
    """Largest power-of-two (>=8) divisor of n that is <= max_tile and strictly
    smaller than n (so there are >=2 grid blocks for megacore sharding), falling
    back to n itself for tiny / indivisible row counts."""
    for t in (1024, 512, 256, 128, 64, 32, 16, 8):
        if t <= max_tile and t < n and n % t == 0:
            return t
    return n


def _parallel(n_axes):
    return pltpu.CompilerParams(dimension_semantics=("parallel",) * n_axes)


def _coord_grid(h, w):
    ys = jnp.linspace(-1 + 1 / h, 1 - 1 / h, h, dtype=jnp.float32)
    xs = jnp.linspace(-1 + 1 / w, 1 - 1 / w, w, dtype=jnp.float32)
    gy, gx = jnp.meshgrid(ys, xs, indexing="ij")
    return jnp.stack([gx, gy], axis=-1)          # (h, w, 2) with (x, y)


def interpolate_bilinear_nhwc(x, size):
    b, _, _, c = x.shape
    return jax.image.resize(x, (b, size[0], size[1], c), method="bilinear")


def get_placeholder_flow(b, h, w):
    g = _coord_grid(h, w)                        # (h, w, 2)
    return jnp.broadcast_to(g[None], (b, h, w, 2))


def _nhwc_to_nchw(x):
    return jnp.transpose(x, (0, 3, 1, 2))


# ----------------------------------------------------------------------------
# Pallas kernels
# ----------------------------------------------------------------------------
def _proj2_kernel(x1_ref, x2_ref, w_ref, b_ref, o1_ref, o2_ref):
    """1x1-conv projection of both feature maps with one resident weight."""
    w = w_ref[...]
    b = b_ref[...]
    o1_ref[...] = jnp.dot(x1_ref[...], w, preferred_element_type=jnp.float32) + b
    o2_ref[...] = jnp.dot(x2_ref[...], w, preferred_element_type=jnp.float32) + b


def pallas_proj_pair(x1, x2, w, b):
    n, cin = x1.shape
    cout = w.shape[1]
    tm = _row_tile(n)
    row = lambda i: (i, 0)
    rep = lambda i: (0, 0)
    return pl.pallas_call(
        _proj2_kernel,
        grid=(n // tm,),
        in_specs=[
            pl.BlockSpec((tm, cin), row),
            pl.BlockSpec((tm, cin), row),
            pl.BlockSpec((cin, cout), rep),
            pl.BlockSpec((1, cout), rep),
        ],
        out_specs=[
            pl.BlockSpec((tm, cout), row),
            pl.BlockSpec((tm, cout), row),
        ],
        out_shape=(
            jax.ShapeDtypeStruct((n, cout), jnp.float32),
            jax.ShapeDtypeStruct((n, cout), jnp.float32),
        ),
        compiler_params=_parallel(1),
    )(x1, x2, w, b.reshape(1, cout))


def _gp_kernel(f1_ref, f2_ref, emb_ref, o_ref, *, scale):
    """GP / correlation posterior for a tile of query rows:
    softmax(f1_tile f2^T / sqrt(C)) @ coord-embedding."""
    a = f1_ref[0] * scale                      # fold 1/sqrt(C) into the small (tq, C) tile
    b = f2_ref[0]                              # (HW, C), resident per batch
    s = jax.lax.dot_general(a, b, (((1,), (1,)), ((), ())),
                            preferred_element_type=jnp.float32)      # (tq, HW)
    s = s - jnp.max(s, axis=-1, keepdims=True)
    p = jnp.exp(s)
    p = p * pl.reciprocal(jnp.sum(p, axis=-1, keepdims=True), approx=True)
    o_ref[0] = jnp.dot(p, emb_ref[...], preferred_element_type=jnp.float32)


def pallas_gp(f1b, f2b, emb):
    """f1b/f2b: (B, HW, C) channels-last features; emb: (HW, D) coordinate embedding."""
    bsz, hw, c = f1b.shape
    d = emb.shape[1]
    tq = _row_tile(hw)
    # NOTE: f2 + emb stay resident per batch; only a (tq, HW) score block is live,
    # which keeps the footprint inside v7x's smaller VMEM at real resolutions.
    return pl.pallas_call(
        partial(_gp_kernel, scale=1.0 / math.sqrt(c)),
        grid=(bsz, hw // tq),
        in_specs=[
            pl.BlockSpec((1, tq, c), lambda b, q: (b, q, 0)),
            pl.BlockSpec((1, hw, c), lambda b, q: (b, 0, 0)),
            pl.BlockSpec((hw, d), lambda b, q: (0, 0)),
        ],
        out_specs=pl.BlockSpec((1, tq, d), lambda b, q: (b, q, 0)),
        out_shape=jax.ShapeDtypeStruct((bsz, hw, d), jnp.float32),
        compiler_params=_parallel(2),
    )(f1b, f2b, emb)


def _embed_kernel(gp_ref, f1_ref, old_ref,
                  w1g_ref, w1f_ref, w1o_ref, b1_ref, w2_ref, b2_ref,
                  cls_ref, cert_ref, hid_ref, *, num_cls):
    """Fused embedding decoder: concat-free first layer (split weight row-blocks),
    ReLU hidden kept in VMEM, second layer, cls/certainty split in-kernel."""
    h = jnp.dot(gp_ref[...], w1g_ref[...], preferred_element_type=jnp.float32)
    h = h + jnp.dot(f1_ref[...], w1f_ref[...], preferred_element_type=jnp.float32)
    h = h + jnp.dot(old_ref[...], w1o_ref[...], preferred_element_type=jnp.float32)
    h = jnp.maximum(h + b1_ref[...], 0.0)
    hid_ref[...] = h                                        # new old_stuff
    out = jnp.dot(h, w2_ref[...], preferred_element_type=jnp.float32) + b2_ref[...]
    cls_ref[...] = out[:, :num_cls]
    cert_ref[...] = out[:, num_cls:]


def pallas_embedding_decoder(gp2d, f12d, old2d, p):
    n = gp2d.shape[0]
    dg, df, dh = gp2d.shape[1], f12d.shape[1], old2d.shape[1]
    cout = p["w2"].shape[1]
    num_cls = cout - 1
    w1 = p["w1"]
    w1g, w1f, w1o = w1[:dg], w1[dg:dg + df], w1[dg + df:]
    tm = _row_tile(n)
    row = lambda i: (i, 0)
    rep = lambda i: (0, 0)
    return pl.pallas_call(
        partial(_embed_kernel, num_cls=num_cls),
        grid=(n // tm,),
        in_specs=[
            pl.BlockSpec((tm, dg), row),
            pl.BlockSpec((tm, df), row),
            pl.BlockSpec((tm, dh), row),
            pl.BlockSpec((dg, dh), rep),
            pl.BlockSpec((df, dh), rep),
            pl.BlockSpec((dh, dh), rep),
            pl.BlockSpec((1, dh), rep),
            pl.BlockSpec((dh, cout), rep),
            pl.BlockSpec((1, cout), rep),
        ],
        out_specs=[
            pl.BlockSpec((tm, num_cls), row),
            pl.BlockSpec((tm, 1), row),
            pl.BlockSpec((tm, dh), row),
        ],
        out_shape=(
            jax.ShapeDtypeStruct((n, num_cls), jnp.float32),
            jax.ShapeDtypeStruct((n, 1), jnp.float32),
            jax.ShapeDtypeStruct((n, dh), jnp.float32),
        ),
        compiler_params=_parallel(1),
    )(gp2d, f12d, old2d, w1g, w1f, w1o,
      p["b1"].reshape(1, dh), p["w2"], p["b2"].reshape(1, cout))


def _refiner_kernel(f1_ref, f2_ref, fl_ref, lg_ref,
                    w1a_ref, w1b_ref, w1fl_ref, w1lg_ref, b1_ref, w2_ref, b2_ref,
                    dflow_ref, dcert_ref):
    """Fused conv refiner: concat-free first layer, ReLU hidden in VMEM, second layer.
    flow/logits contributions (K=2 / K=1) use VPU broadcasts instead of degenerate dots."""
    h = jnp.dot(f1_ref[...], w1a_ref[...], preferred_element_type=jnp.float32)
    h = h + jnp.dot(f2_ref[...], w1b_ref[...], preferred_element_type=jnp.float32)
    fl = fl_ref[...]
    w1fl = w1fl_ref[...]
    h = h + fl[:, 0:1] * w1fl[0:1, :] + fl[:, 1:2] * w1fl[1:2, :]
    h = h + lg_ref[...] * w1lg_ref[...]
    h = jnp.maximum(h + b1_ref[...], 0.0)
    out = jnp.dot(h, w2_ref[...], preferred_element_type=jnp.float32) + b2_ref[...]
    dflow_ref[...] = out[:, 0:2]
    dcert_ref[...] = out[:, 2:3]


def pallas_conv_refiner(f12d, f22d, flow2d, lg2d, p):
    # TODO(synk): RoMa's ConvRefiner warps f2 with F.grid_sample(flow) before the
    # conv stack; that data-dependent gather is not reproduced in this synthetic refiner.
    n, c = f12d.shape
    dh = p["w1"].shape[1]
    w1 = p["w1"]
    w1a, w1b = w1[:c], w1[c:2 * c]
    w1fl, w1lg = w1[2 * c:2 * c + 2], w1[2 * c + 2:]
    tm = _row_tile(n)
    row = lambda i: (i, 0)
    rep = lambda i: (0, 0)
    return pl.pallas_call(
        _refiner_kernel,
        grid=(n // tm,),
        in_specs=[
            pl.BlockSpec((tm, c), row),
            pl.BlockSpec((tm, c), row),
            pl.BlockSpec((tm, 2), row),
            pl.BlockSpec((tm, 1), row),
            pl.BlockSpec((c, dh), rep),
            pl.BlockSpec((c, dh), rep),
            pl.BlockSpec((2, dh), rep),
            pl.BlockSpec((1, dh), rep),
            pl.BlockSpec((1, dh), rep),
            pl.BlockSpec((dh, 3), rep),
            pl.BlockSpec((1, 3), rep),
        ],
        out_specs=[
            pl.BlockSpec((tm, 2), row),
            pl.BlockSpec((tm, 1), row),
        ],
        out_shape=(
            jax.ShapeDtypeStruct((n, 2), jnp.float32),
            jax.ShapeDtypeStruct((n, 1), jnp.float32),
        ),
        compiler_params=_parallel(1),
    )(f12d, f22d, flow2d, lg2d, w1a, w1b, w1fl, w1lg,
      p["b1"].reshape(1, dh), p["w2"], p["b2"].reshape(1, 3))


def _cls_to_flow_kernel(cls_ref, tab_ref, o_ref, *, res):
    """Per-pixel tile: first-argmax over classes, counted mask of the 5 clamped
    neighbours (duplicates keep multiplicity, matching torch.gather on clamped
    indices), then one small (tm,C)@(C,3) MXU dot against [gx, gy, 1]. The softmax
    normalizer cancels in flow = sum(p*G)/sum(p), so only exp(x - max) is needed."""
    x = cls_ref[...]                                        # (tm, C) logits
    tm, c = x.shape
    col = jax.lax.broadcasted_iota(jnp.int32, (tm, c), 1)
    xmax = jnp.max(x, axis=-1, keepdims=True)
    mode = jnp.min(jnp.where(x >= xmax, col, c), axis=-1, keepdims=True)   # first argmax
    e = jnp.exp(x - xmax)                                   # unnormalized softmax
    msum = jnp.zeros((tm, c), jnp.float32)
    for off in (-1, 0, 1, -res, res):
        idx = jnp.clip(mode + off, 0, c - 1)                # (tm, 1)
        msum = msum + (col == idx).astype(jnp.float32)
    q = e * msum
    acc = jnp.dot(q, tab_ref[...], preferred_element_type=jnp.float32)     # (tm, 3)
    inv_tot = pl.reciprocal(acc[:, 2:3], approx=True)
    o_ref[...] = acc[:, :2] * inv_tot


def cls_to_flow_refine(cls2d, b, h, w):
    n, c = cls2d.shape
    res = round(math.sqrt(c))
    lin = jnp.linspace(-1 + 1 / res, 1 - 1 / res, res, dtype=jnp.float32)
    gx = jnp.tile(lin, res)                  # class k -> x = lin[k % res]
    gy = jnp.repeat(lin, res)                # class k -> y = lin[k // res]
    tab = jnp.stack([gx, gy, jnp.ones_like(gx)], axis=-1)   # (C, 3)
    tm = _row_tile(n, max_tile=1024)
    flow2d = pl.pallas_call(
        partial(_cls_to_flow_kernel, res=res),
        grid=(n // tm,),
        in_specs=[
            pl.BlockSpec((tm, c), lambda i: (i, 0)),
            pl.BlockSpec((c, 3), lambda i: (0, 0)),
        ],
        out_specs=pl.BlockSpec((tm, 2), lambda i: (i, 0)),
        out_shape=jax.ShapeDtypeStruct((n, 2), jnp.float32),
        compiler_params=_parallel(1),
    )(cls2d, tab)
    return flow2d.reshape(b, h, w, 2)        # (B, H, W, 2), same as the torch helper


# ----------------------------------------------------------------------------
# Decoder (channels-last NHWC internally; corresps flow/certainty in NCHW)
# ----------------------------------------------------------------------------
class Decoder:
    def __init__(self, params, scales, coarse_scales, hidden_dim, refine_init=4):
        self.params = params
        self.scales = scales                 # list of str, coarsest first
        self.coarse_scales = coarse_scales   # set of int
        self.hidden_dim = hidden_dim
        self.refine_init = refine_init

    # synthetic submodules ----------------------------------------------------
    def _proj(self, scale, f1_s, f2_s):
        p = self.params["proj"][scale]
        b, h, w, cin = f1_s.shape
        cout = p["w"].shape[1]
        y1, y2 = pallas_proj_pair(f1_s.reshape(-1, cin), f2_s.reshape(-1, cin),
                                  p["w"], p["b"])
        return y1.reshape(b, h, w, cout), y2.reshape(b, h, w, cout)

    def _gp(self, scale, f1_s, f2_s):
        p = self.params["gp"][scale]
        b, h, w, c = f1_s.shape
        coords = _coord_grid(h, w).reshape(h * w, 2)
        emb = coords @ p["emb_w"]            # tiny (HW,2)@(2,D); glue
        out = pallas_gp(f1_s.reshape(b, h * w, c), f2_s.reshape(b, h * w, c), emb)
        return out.reshape(b, h, w, -1)

    def _embedding_decoder(self, gp_posterior, f1_s, old_stuff):
        dg = gp_posterior.shape[-1]
        df = f1_s.shape[-1]
        dh = old_stuff.shape[-1]
        return pallas_embedding_decoder(
            gp_posterior.reshape(-1, dg), f1_s.reshape(-1, df),
            old_stuff.reshape(-1, dh), self.params["embed"])

    def _conv_refiner(self, scale, f1_s, f2_s, flow, scale_factor, logits):
        b, h, w, c = f1_s.shape
        if not hasattr(logits, "ndim"):
            logits = jnp.zeros((b, h, w, 1), jnp.float32)
        dflow2d, dcert2d = pallas_conv_refiner(
            f1_s.reshape(-1, c), f2_s.reshape(-1, c),
            flow.reshape(-1, 2), logits.reshape(-1, 1),
            self.params["refiner"][scale])
        return dflow2d.reshape(b, h, w, 2), dcert2d.reshape(b, h, w, 1)

    # forward (inference path; training-only dict entries omitted) ------------
    def __call__(self, f1, f2, upsample=False, flow=None, certainty=None, scale_factor=1):
        # f1/f2: dicts of NHWC feature maps keyed by int scale (channels-last).
        all_scales = self.scales if not upsample else ["8", "4", "2", "1"]
        sizes = {s: f1[s].shape[1:3] for s in f1}
        h, w = sizes[1]
        b = f1[1].shape[0]
        coarsest_scale = int(all_scales[0])
        old_stuff = jnp.zeros((b, *sizes[coarsest_scale], self.hidden_dim), jnp.float32)
        corresps = {}
        if not upsample:
            flow = get_placeholder_flow(b, *sizes[coarsest_scale])
            certainty = 0.0
        else:
            # externally supplied flow/certainty are expected NHWC here
            flow = interpolate_bilinear_nhwc(flow, sizes[coarsest_scale])
            certainty = interpolate_bilinear_nhwc(certainty, sizes[coarsest_scale])
        for new_scale in all_scales:
            ins = int(new_scale)
            corresps[ins] = {}
            f1_s, f2_s = f1[ins], f2[ins]
            if new_scale in self.params["proj"]:
                # TPU/CPU branch of get_autocast_params -> autocast disabled, cast to f32
                f1_s, f2_s = self._proj(new_scale,
                                        f1_s.astype(jnp.float32),
                                        f2_s.astype(jnp.float32))
            hs, ws = sizes[ins]
            if ins in self.coarse_scales:
                old_stuff = interpolate_bilinear_nhwc(old_stuff, sizes[ins])
                gp_posterior = self._gp(new_scale, f1_s, f2_s)
                cls2d, cert2d, hid2d = self._embedding_decoder(gp_posterior, f1_s, old_stuff)
                certainty = cert2d.reshape(b, hs, ws, 1)
                old_stuff = hid2d.reshape(b, hs, ws, self.hidden_dim)
                # embedding_decoder.is_classifier == True
                flow = cls_to_flow_refine(cls2d, b, hs, ws)          # (B, H, W, 2)
            if new_scale in self.params["refiner"]:
                delta_flow, delta_certainty = self._conv_refiner(
                    new_scale, f1_s, f2_s, flow, scale_factor, certainty)
                displacement = ins * delta_flow * jnp.array(
                    [1.0 / (self.refine_init * w), 1.0 / (self.refine_init * h)],
                    jnp.float32)
                flow = flow + displacement
                certainty = certainty + delta_certainty
            corresps[ins]["flow"] = _nhwc_to_nchw(flow)
            corresps[ins]["certainty"] = (
                _nhwc_to_nchw(certainty) if hasattr(certainty, "ndim") else certainty)
            if new_scale != "1":
                flow = interpolate_bilinear_nhwc(flow, sizes[ins // 2])
                if hasattr(certainty, "ndim"):
                    certainty = interpolate_bilinear_nhwc(certainty, sizes[ins // 2])
        return corresps


# ----------------------------------------------------------------------------
# Deterministic parameter init + demo
# ----------------------------------------------------------------------------
def _init_linear(key, cin, cout, scale=0.1):
    kw, kb = jax.random.split(key)
    return {"w": scale * jax.random.normal(kw, (cin, cout), jnp.float32),
            "b": scale * jax.random.normal(kb, (cout,), jnp.float32)}


if __name__ == "__main__":
    key = jax.random.PRNGKey(0)
    B = 2
    base_hw = 16
    feat_channels = {4: 32, 2: 16, 1: 8}        # feature pyramid channels per scale
    scales = ["4", "2", "1"]
    coarse_scales = {4}                          # embedding_decoder.scales()
    hidden_dim = 32                              # embedding_decoder.hidden_dim
    gp_dim = 16
    cls_res = 8
    num_cls = cls_res * cls_res                  # 64 anchor classes -> cls_to_flow_refine

    keys = iter(jax.random.split(key, 32))

    # feature pyramids, channels-last NHWC (the decoder is channels-last end-to-end)
    f1, f2 = {}, {}
    for s, c in feat_channels.items():
        hs = base_hw // s
        f1[s] = jax.random.normal(next(keys), (B, hs, hs, c), jnp.float32)
        f2[s] = jax.random.normal(next(keys), (B, hs, hs, c), jnp.float32)

    params = {"proj": {}, "gp": {}, "refiner": {}}
    for s, c in feat_channels.items():
        params["proj"][str(s)] = _init_linear(next(keys), c, c)
    params["gp"]["4"] = {"emb_w": 0.1 * jax.random.normal(next(keys), (2, gp_dim), jnp.float32)}
    e1 = _init_linear(next(keys), gp_dim + feat_channels[4] + hidden_dim, hidden_dim)
    e2 = _init_linear(next(keys), hidden_dim, num_cls + 1)
    params["embed"] = {"w1": e1["w"], "b1": e1["b"], "w2": e2["w"], "b2": e2["b"]}
    for s, c in feat_channels.items():
        r1 = _init_linear(next(keys), 2 * c + 2 + 1, 32)   # [f1, f2, flow(2), logits(1)]
        r2 = _init_linear(next(keys), 32, 3)               # delta_flow(2) + delta_certainty(1)
        params["refiner"][str(s)] = {"w1": r1["w"], "b1": r1["b"], "w2": r2["w"], "b2": r2["b"]}

    decoder = Decoder(params, scales, coarse_scales, hidden_dim)
    corresps = decoder(f1, f2)
    corresps = jax.block_until_ready(corresps)

    # sanity on shapes produced by the coarse-to-fine loop (NCHW outputs, torch convention)
    assert corresps[4]["flow"].shape == (B, 2, 4, 4)
    assert corresps[2]["flow"].shape == (B, 2, 8, 8)
    assert corresps[1]["flow"].shape == (B, 2, 16, 16)
    assert corresps[1]["certainty"].shape == (B, 1, 16, 16)
    assert all(bool(jnp.all(jnp.isfinite(corresps[s]["flow"]))) for s in (4, 2, 1))
    print("KERNEL_OK")
</pallas_src>

<mosaic_0001>
module attributes {stable_mosaic.version = 11 : i64} {
  func.func @_proj2_kernel(%arg0: i32, %arg1: memref<16x32xf32, #tpu.memory_space<vmem>>, %arg2: memref<16x32xf32, #tpu.memory_space<vmem>>, %arg3: memref<32x32xf32, #tpu.memory_space<vmem>>, %arg4: memref<1x32xf32, #tpu.memory_space<vmem>>, %arg5: memref<16x32xf32, #tpu.memory_space<vmem>>, %arg6: memref<16x32xf32, #tpu.memory_space<vmem>>) attributes {dimension_semantics = [#tpu.dimension_semantics<parallel>], iteration_bounds = array<i64: 2>, scalar_prefetch = 0 : i64, scratch_operands = 0 : i64, tpu.core_type = #tpu.core_type<tc>, window_params = [{transform_indices = @transform_0, window_bounds = array<i64: 16, 32>}, {transform_indices = @transform_1, window_bounds = array<i64: 16, 32>}, {pipeline_mode = #tpu.pipeline_mode<synchronous>, transform_indices = @transform_2, window_bounds = array<i64: 32, 32>}, {pipeline_mode = #tpu.pipeline_mode<synchronous>, transform_indices = @transform_3, window_bounds = array<i64: 1, 32>}, {transform_indices = @transform_4, window_bounds = array<i64: 16, 32>}, {transform_indices = @transform_5, window_bounds = array<i64: 16, 32>}]} {
    %c0 = arith.constant 0 : index
    %c0_0 = arith.constant 0 : index
    %0 = vector.load %arg3[%c0, %c0_0] : memref<32x32xf32, #tpu.memory_space<vmem>>, vector<32x32xf32>
    %c0_1 = arith.constant 0 : index
    %c0_2 = arith.constant 0 : index
    %1 = vector.load %arg4[%c0_1, %c0_2] : memref<1x32xf32, #tpu.memory_space<vmem>>, vector<1x32xf32>
    %c0_3 = arith.constant 0 : index
    %c0_4 = arith.constant 0 : index
    %2 = vector.load %arg1[%c0_3, %c0_4] : memref<16x32xf32, #tpu.memory_space<vmem>>, vector<16x32xf32>
    %cst = arith.constant dense<0.000000e+00> : vector<16x32xf32>
    %3 = tpu.matmul %2, %0, %cst {dimension_numbers = #tpu.dot_dimension_numbers<[1], [0], [0], [1], [0, 0, 1, 1], [], []>} : vector<16x32xf32>, vector<32x32xf32>, vector<16x32xf32> -> vector<16x32xf32>
    %4 = vector.broadcast %1 : vector<1x32xf32> to vector<16x32xf32>
    %5 = arith.addf %3, %4 : vector<16x32xf32>
    %c0_5 = arith.constant 0 : index
    %c0_6 = arith.constant 0 : index
    %6 = vector.load %arg5[%c0_5, %c0_6] : memref<16x32xf32, #tpu.memory_space<vmem>>, vector<16x32xf32>
    tpu.vector_store %arg5[%c0_5, %c0_6], %5 {strides = array<i32>} : memref<16x32xf32, #tpu.memory_space<vmem>>, vector<16x32xf32>,
    %c0_7 = arith.constant 0 : index
    %c0_8 = arith.constant 0 : index
    %7 = vector.load %arg2[%c0_7, %c0_8] : memref<16x32xf32, #tpu.memory_space<vmem>>, vector<16x32xf32>
    %cst_9 = arith.constant dense<0.000000e+00> : vector<16x32xf32>
    %8 = tpu.matmul %7, %0, %cst_9 {dimension_numbers = #tpu.dot_dimension_numbers<[1], [0], [0], [1], [0, 0, 1, 1], [], []>} : vector<16x32xf32>, vector<32x32xf32>, vector<16x32xf32> -> vector<16x32xf32>
    %9 = vector.broadcast %1 : vector<1x32xf32> to vector<16x32xf32>
    %10 = arith.addf %8, %9 : vector<16x32xf32>
    %c0_10 = arith.constant 0 : index
    %c0_11 = arith.constant 0 : index
    %11 = vector.load %arg6[%c0_10, %c0_11] : memref<16x32xf32, #tpu.memory_space<vmem>>, vector<16x32xf32>
    tpu.vector_store %arg6[%c0_10, %c0_11], %10 {strides = array<i32>} : memref<16x32xf32, #tpu.memory_space<vmem>>, vector<16x32xf32>,
    return
  }
  func.func @transform_0(%arg0: i32) -> (i32, i32) {
    %c0_i32 = arith.constant 0 : i32
    %c0_i32_0 = arith.constant 0 : i32
    return %arg0, %c0_i32 : i32, i32
  }
  func.func @transform_1(%arg0: i32) -> (i32, i32) {
    %c0_i32 = arith.constant 0 : i32
    %c0_i32_0 = arith.constant 0 : i32
    return %arg0, %c0_i32 : i32, i32
  }
  func.func @transform_2(%arg0: i32) -> (i32, i32) {
    %c0_i32 = arith.constant 0 : i32
    %c0_i32_0 = arith.constant 0 : i32
    %c0_i32_1 = arith.constant 0 : i32
    return %c0_i32, %c0_i32_0 : i32, i32
  }
  func.func @transform_3(%arg0: i32) -> (i32, i32) {
    %c0_i32 = arith.constant 0 : i32
    %c0_i32_0 = arith.constant 0 : i32
    %c0_i32_1 = arith.constant 0 : i32
    return %c0_i32, %c0_i32_0 : i32, i32
  }
  func.func @transform_4(%arg0: i32) -> (i32, i32) {
    %c0_i32 = arith.constant 0 : i32
    %c0_i32_0 = arith.constant 0 : i32
    return %arg0, %c0_i32 : i32, i32
  }
  func.func @transform_5(%arg0: i32) -> (i32, i32) {
    %c0_i32 = arith.constant 0 : i32
    %c0_i32_0 = arith.constant 0 : i32
    return %arg0, %c0_i32 : i32, i32
  }
}

</mosaic_0001>

<bundles_post_ra>
// kernel: tpu_custom_call.1
= control target key start
LH: loop header
LB: loop body
LE: loop exit
PB: predicated region body
PF: predicated region fallthrough
CT: control target
= control target key end

     0   :  { %s1362_s0 = inlined_call_operand.hbm [shape: f32[32,32], index: 0, kind: input, shape index: {}]   ;;  %s1363_s1 = inlined_call_operand.hbm [shape: f32[32,32], index: 1, kind: input, shape index: {}]   ;;  %s1364_s2 = inlined_call_operand.hbm [shape: f32[32,32], index: 2, kind: input, shape index: {}]   ;;  %s1365_s3 = inlined_call_operand.vmem [shape: f32[1,32], index: 3, kind: input, shape index: {}]   ;;  %s1366_s4 = inlined_call_operand.hbm [shape: f32[32,32], index: 4, kind: output, shape index: {0}]   ;;  %s1367_s5 = inlined_call_operand.hbm [shape: f32[32,32], index: 5, kind: output, shape index: {1}]  }
   0x1   :  { %1376 = sst [smem:[#allocation18_spill]] %s1362_s0 }
   0x2   :  { %1377 = sst [smem:[#allocation19_spill]] %s1364_s2 }
   0x3   :  { %11 = vsyncpa [#allocation3], 0 }
   0x4   :  { %13 = vsyncpa [#allocation3 + $0x1], 0 }
   0x5   :  { %14 = vsyncpa [#allocation6], 0 }
   0x6   :  { %16 = vsyncpa [#allocation6 + $0x1], 0 }
   0x7   :  { %17 = vsyncpa [#allocation4], 0 }
   0x8   :  { %19 = vsyncpa [#allocation4 + $0x1], 0 }
   0x9   :  { %20 = vsyncpa [#allocation10], 0 }
   0xa   :  { %22 = vsyncpa [#allocation10 + $0x1], 0  ;;  %s1055_s18 = smov 0   ;;  %s1057_s19 = smov 0  }
   0xb   :  { %s1059_s20 = smov 0   ;;  %s1061_s21 = smov 0  }
   0xc LB: > { %1378 = sst [smem:[#allocation16_spill]] %s1010_s20  ;;  %s1076_s22 = sadd.s32 4294967295, %s1014_s21   ;;  %s1014_s21 = sphi %s1061_s21, %s1402_s21   ;;  %s1010_s20 = sphi %s1059_s20, %s1401_s20   ;;  %s1006_s19 = sphi %s1057_s19, %s1400_s19   ;;  %s1002_s18 = sphi %s1055_s18, %s1399_s18  }
   0xd   : > { %s666_s23 = sadd.s32 4294967294, %s1014_s21   ;;  %p48_p0 = scmp.ne.s32.totalorder %s1006_s19, %s1002_s18 }
   0xe   : > { %p1368_p1 = scmp.eq.s32.totalorder %s1076_s22, 0  ;;  %p146_p3 = scmp.eq.s32.totalorder %s666_s23, 1 }
   0xf   : > { %p667_p5 = scmp.ge.s32.totalorder %s1014_s21, 1  ;;  %p179_p7 = scmp.lt.s32.totalorder %s1014_s21, 3 }
  0x10   : > { %p1085_p4 = por %p1368_p1, %p48_p0  ;;  %p1090_p6 = por %p146_p3, %p48_p0 }
  0x11   : > { %p1095_p8 = pnand %p667_p5, %p179_p7  ;;  %s1016_s27 = smov [#allocation7]  }
  0x12   : > { %s1379_s24 = scalar_select %p1085_p4, 1, 0 }
  0x13   : > { %s1380_s25 = scalar_select %p1090_p6, 1, 0 }
  0x14   : > { %s1381_s26 = scalar_select %p1095_p8, 1, 0 }
  0x15   : > { %s191_s28 = sshll.u32 %s1016_s27, 4  ;;  %p761_p9 = pneg %p1095_p8  ;;  %s1099_s28 = int_to_ptr.vmem [resolvable:$true] %s191_s28 }
  0x16   : > { %s1111_s30 = sadd.s32 1, %s1014_s21   ;;  %s35_s6 = sadd.s32 1, %s1010_s20 }
  0x17   : > { %p1106_p11 = pnand %p761_p9, %p1368_p1  ;;  %s32_s7 = ssub.s32 %s1014_s21, %s1111_s30 }
  0x18   : > { %s1383_s2 = sld [smem:[#allocation19_spill]] }
  0x19   : > { %p822_p13 = pneg %p1106_p11 }
  0x1e   : > { %s820_s10 = scalar_lea.hbm %s1383_s2, 512 }
  0x1f   : > { %p821_p12 = scmp.ne.s32.totalorder %s1383_s2, %s820_s10  ;;  %p827_p5 = scmp.lt.u32.totalorder %s820_s10, %s1383_s2 }
  0x21   : > { %p823_p0 = pnand %p822_p13, %p821_p12 }
  0x23   : > { %p824_p3 = pneg %p823_p0 }
  0x25   : > { %p829_p7 = pnand %p827_p5, %p824_p3 }
  0x27   : > { %832 = shalt.err (!%p829_p7)
}
  0x28   : > { %s833_s15 = scalar_lea.vmem %s1099_s28, 512  ;;  %p841_p2 = scmp.lt.s32.totalorder %s1099_s28, %s1099_s28 }
  0x29   : > { %p834_p9 = scmp.ne.s32.totalorder %s1099_s28, %s833_s15  ;;  %p842_p6 = scmp.lt.s32.totalorder %s833_s15, %s833_s15 }
  0x2b   : > { %p836_p10 = pnand %p834_p9, %p822_p13  ;;  %p843_p4 = por %p842_p6, %p841_p2 }
  0x2d   : > { %p837_p1 = pneg %p836_p10 }
  0x2f   : > { %p844_p8 = pnand %p843_p4, %p837_p1 }
  0x31   : > { %847 = shalt.err (!%p844_p8)
}
  0x32   : > { %s1371_s16 = smov 128   ;;  %s1373_s17 = smov 8  }
  0x33   : > { %764 = dma.hbm_to_vmem [thread:$0]  (!%p1106_p11), %s1383_s2, 512, %s1099_s28, [#allocation6], %s1371_s16, %s1371_s16, %s1373_s17  }
  0x34   : > { %p33_p1 = scmp.eq.s32.totalorder %s32_s7, 0  ;;  %p42_p2 = scmp.ne.s32.totalorder %s1010_s20, %s1006_s19 }
  0x35   : > { %p43_p4 = scmp.eq.s32.totalorder %s1014_s21, 0  ;;  %p780_p6 = scmp.lt.s32.totalorder %s1014_s21, 2 }
  0x36   : > { %s1145_s8 = scalar_select %p33_p1, %s1010_s20, %s35_s6  }
  0x37   : > { %p44_p8 = por %p43_p4, %p42_p2  ;;  %p1385_p10 = scmp.eq.s32.totalorder %s1076_s22, 1 }
  0x38   : > { %1384 = sst [smem:[#allocation17_spill]] %s1145_s8  ;;  %s208_s29 = sand.u32 1, %s1010_s20  }
  0x39   : > { %p1149_p12 = por %p1385_p10, %p42_p2  ;;  %s695_s10 = sshll.u32 %s1014_s21, 8 }
  0x3a   : > { %s1155_s11 = sshll.u32 %s208_s29, 4  ;;  %s1387_s0 = sld [smem:[#allocation18_spill]] }
  0x3b   : > { %s212_s6 = scalar_lea.vmem [#allocation2], %s1155_s11  ;;  %p1163_p11 = pnand %p780_p6, %p44_p8 }
  0x3c   : > { %s219_s7 = sshll.u32 %s212_s6, 4  ;;  %s1172_s27 = scalar_lea.hbm %s1363_s1, %s695_s10  ;;  %s1167_s7 = int_to_ptr.vmem [resolvable:$true] %s219_s7 }
  0x3d   : > { %s1174_s12 = scalar_lea.sflag [#allocation3], %s208_s29  ;;  %p850_p0 = pneg %p1163_p11 }
  0x40   : > { %s1160_s28 = scalar_lea.hbm %s1387_s0, %s695_s10  ;;  %s853_s17 = scalar_lea.hbm %s1387_s0, 512 }
  0x41   : > { %s848_s13 = scalar_lea.hbm %s1160_s28, 256  ;;  %p854_p7 = scmp.lt.u32.totalorder %s1160_s28, %s1387_s0 }
  0x42   : > { %p849_p13 = scmp.ne.s32.totalorder %s1160_s28, %s848_s13  ;;  %p855_p9 = scmp.lt.u32.totalorder %s853_s17, %s848_s13 }
  0x43   : > { %p857_p2 = scmp.lt.u32.totalorder %s848_s13, %s1160_s28 }
  0x44   : > { %p851_p3 = pnand %p850_p0, %p849_p13  ;;  %p856_p1 = por %p855_p9, %p854_p7 }
  0x46   : > { %p852_p5 = pneg %p851_p3  ;;  %p858_p4 = por %p857_p2, %p856_p1 }
  0x48   : > { %p859_p6 = pnand %p858_p4, %p852_p5 }
  0x4a   : > { %862 = shalt.err (!%p859_p6)
}
  0x4b   : > { %s863_s29 = scalar_lea.vmem %s1167_s7, 256  ;;  %s1019_s16 = smov [#allocation2]  }
  0x4c   : > { %p864_p8 = scmp.ne.s32.totalorder %s1167_s7, %s863_s29  ;;  %s868_s10 = sshll.u32 %s1019_s16, 4  ;;  %s869_s10 = int_to_ptr.vmem [resolvable:$false] %s868_s10 }
  0x4d   : > { %s870_s2 = scalar_lea.vmem %s869_s10, 512  ;;  %p871_p3 = scmp.lt.s32.totalorder %s1167_s7, %s869_s10 }
  0x4e   : > { %p866_p10 = pnand %p864_p8, %p850_p0  ;;  %p872_p7 = scmp.lt.s32.totalorder %s870_s2, %s863_s29 }
  0x50   : > { %p867_p13 = pneg %p866_p10  ;;  %p873_p9 = por %p872_p7, %p871_p3 }
  0x52   : > { %p874_p1 = pnand %p873_p9, %p867_p13 }
  0x54   : > { %877 = shalt.err (!%p874_p1)
}
  0x55   : > { %s1389_s17 = smov 8   ;;  %s1390_s8 = smov 128  }
  0x56   : > { %768 = dma.hbm_to_vmem [thread:$0]  (!%p1163_p11), %s1160_s28, 256, %s1167_s7, %s1174_s12, %s1390_s8, %s1390_s8, %s1389_s17  }
  0x57   : > { %s233_s15 = scalar_lea.vmem [#allocation5], %s1155_s11  ;;  %s229_s13 = sand.u32 1, %s1014_s21  }
  0x58   : > { %s240_s23 = sshll.u32 %s233_s15, 4  ;;  %s1209_s6 = scalar_lea.sflag [#allocation6], %s229_s13  ;;  %s1207_s23 = int_to_ptr.vmem [resolvable:$true] %s240_s23 }
  0x59   : > { %s878_s29 = scalar_lea.hbm %s1172_s27, 256  ;;  %s883_s2 = scalar_lea.hbm %s1363_s1, 512 }
  0x5a   : > { %p879_p5 = scmp.ne.s32.totalorder %s1172_s27, %s878_s29  ;;  %p884_p6 = scmp.lt.u32.totalorder %s1172_s27, %s1363_s1 }
  0x5b   : > { %p885_p8 = scmp.lt.u32.totalorder %s883_s2, %s878_s29  ;;  %p887_p13 = scmp.lt.u32.totalorder %s878_s29, %s1172_s27 }
  0x5c   : > { %p881_p2 = pnand %p879_p5, %p850_p0 }
  0x5d   : > { %p886_p10 = por %p885_p8, %p884_p6 }
  0x5e   : > { %p882_p4 = pneg %p881_p2 }
  0x5f   : > { %p888_p3 = por %p887_p13, %p886_p10 }
  0x61   : > { %p889_p7 = pnand %p888_p3, %p882_p4 }
  0x63   : > { %892 = shalt.err (!%p889_p7)
}
  0x64   : > { %s893_s11 = scalar_lea.vmem %s1207_s23, 256  ;;  %s1020_s28 = smov [#allocation5]  }
  0x65   : > { %p894_p9 = scmp.ne.s32.totalorder %s1207_s23, %s893_s11  ;;  %s898_s7 = sshll.u32 %s1020_s28, 4  ;;  %s899_s7 = int_to_ptr.vmem [resolvable:$false] %s898_s7 }
  0x66   : > { %s900_s0 = scalar_lea.vmem %s899_s7, 512  ;;  %p901_p2 = scmp.lt.s32.totalorder %s1207_s23, %s899_s7 }
  0x67   : > { %p896_p1 = pnand %p894_p9, %p850_p0  ;;  %p902_p6 = scmp.lt.s32.totalorder %s900_s0, %s893_s11 }
  0x69   : > { %p897_p5 = pneg %p896_p1  ;;  %p903_p8 = por %p902_p6, %p901_p2 }
  0x6b   : > { %p904_p10 = pnand %p903_p8, %p897_p5 }
  0x6d   : > { %907 = shalt.err (!%p904_p10)
}
  0x6e   : > { %771 = dma.hbm_to_vmem [thread:$0]  (!%p1163_p11), %s1172_s27, 256, %s1207_s23, %s1209_s6, %s1390_s8, %s1390_s8, %s1389_s17  }
  0x6f   : > { %p1391_p0 = scmp.ne.s32.totalorder %s1381_s26, 0 }
  0x70   : > { %s1241_s20 = sand.u32 (!%p1391_p0), 1, %s1006_s19   ;;  %p1392_p4 = scmp.ne.s32.totalorder (!%p1391_p0), %s1379_s24, 0 }
  0x71   : > { %252 = sbr.rel (%p1391_p0) target bundleno = 392 (0x188), region = 36  ;;  %s1244_s12 = sshll.u32 (!%p1391_p0), %s1241_s20, 4 }
  0x72   : > { %s255_s14 = scalar_lea.sflag (!%p1391_p0), [#allocation3], %s1241_s20  ;;  %s258_s15 = scalar_lea.vmem (!%p1391_p0), [#allocation2], %s1244_s12 }
  0x78   : > { %981 = dma.done.wait (%p1392_p4), %s255_s14, 256  }
  0x79   : > { %983 = vsyncadd (%p1392_p4), %s255_s14, 4294967040  ;;  %s263_s26 = sand.u32 1, %s1076_s22   ;;  %s267_s17 = scalar_lea.vmem [#allocation5], %s1244_s12 }
  0x7a   : > { %s264_s27 = scalar_lea.sflag [#allocation6], %s263_s26 }
  0x7b   : > { %985 = dma.done.wait (%p1392_p4), %s264_s27, 256  }
  0x7c   : > { %987 = vsyncadd (%p1392_p4), %s264_s27, 4294967040  ;;  %p1393_p11 = scmp.eq.s32.totalorder %s1076_s22, 0 }
  0x7e   : > { %989 = dma.done.wait (%p1393_p11), [#allocation6], 512   ;;  %p1394_p13 = pmov %p1393_p11 }
  0x7f   : > { %vm325_vm0 = vcmask 261120   ;;  %v312_v0 = vld [vmem:[#allocation7] sm:$0xff]  ;;  %v313_v1 = vld [vmem:[#allocation7 + $0x8] sm:$0xff]  ;;  %v314_v2 = vld [vmem:[#allocation7 + $0x10] sm:$0xff]  ;;  %s300_s24 = scalar_lea.vmem [#allocation8], %s1244_s12  ;;  %s307_s23 = scalar_lea.vmem [#allocation9], %s1244_s12 }
  0x80   : > { %991 = vsyncadd (%p1394_p13), [#allocation6], 4294966784  ;;  %v733_v3 = vpack.c.bf16 %v313_v1, %v312_v0  ;;  %v315_v4 = vld [vmem:[#allocation7 + $0x18] sm:$0xff]  ;;  %v317_v5 = vld [vmem:[%s258_s15] sm:$0xff]  ;;  %s513_s8 = sshll.u32 %s300_s24, 4  ;;  %s529_s13 = sshll.u32 %s307_s23, 4  ;;  %s1272_s8 = int_to_ptr.vmem [resolvable:$true] %s513_s8  ;;  %s1274_s13 = int_to_ptr.vmem [resolvable:$true] %s529_s13 }
  0x81   : > { %v409_v6 = vld [vmem:[%s267_s17] sm:$0xff]  ;;  %v737_v7 = vpack.c.bf16 %v315_v4, %v314_v2  ;;  %719 = vmatprep.mubr.msk.f32.mxu0 %vm325_vm0, %v317_v5  ;;  %v318_v8 = vld [vmem:[%s258_s15 + $0x8] sm:$0xff]  ;;  %s697_s16 = sshll.u32 %s1076_s22, 8  ;;  %s495_s0 = scalar_lea.sflag [#allocation4], %s1241_s20 }
  0x82   : > { %730 = vmatprep.mubr.msk.f32.mxu1 %vm325_vm0, %v409_v6  ;;  %734 = vmatprep.subr.bf16.mxu0 %v733_v3  ;;  %v410_v9 = vld [vmem:[%s267_s17 + $0x8] sm:$0xff]  ;;  %v682_v10 = vld [vmem:[%s1365_s3] ss:$0 sm:$0xff]  ;;  %s1279_s11 = scalar_lea.hbm %s1366_s4, %s697_s16  ;;  %s1286_s7 = scalar_lea.hbm %s1367_s5, %s697_s16 }
  0x83   : > { %742 = vmatprep.subr.bf16.mxu1 %v733_v3  ;;  %736 = vmatpush3.bf16.msra.mxu0 %v733_v3  ;;  %s908_s12 = scalar_lea.vmem %s1272_s8, 256  ;;  %s1021_s14 = smov [#allocation8]  }
  0x84   : > { %744 = vmatpush3.bf16.msra.mxu1 %v733_v3  ;;  %738 = vmatprep.subr.bf16.mxu0 %v737_v7  ;;  %p909_p3 = scmp.ne.s32.totalorder %s1272_s8, %s908_s12  ;;  %s912_s15 = sshll.u32 %s1021_s14, 4  ;;  %s913_s15 = int_to_ptr.vmem [resolvable:$false] %s912_s15 }
  0x85   : > { %746 = vmatprep.subr.bf16.mxu1 %v737_v7  ;;  %s914_s26 = scalar_lea.vmem %s913_s15, 512  ;;  %p915_p1 = scmp.lt.s32.totalorder %s1272_s8, %s913_s15 }
  0x86   : > { %p910_p7 = pnand %p909_p3, %p1149_p12  ;;  %p916_p5 = scmp.lt.s32.totalorder %s914_s26, %s908_s12 }
  0x87   : > { %740 = vmatpush3.bf16.msra.mxu0 %v737_v7 }
  0x88   : > { %748 = vmatpush3.bf16.msra.mxu1 %v737_v7  ;;  %p911_p9 = pneg %p910_p7  ;;  %p917_p2 = por %p916_p5, %p915_p1 }
  0x8a   : > { %720 = vmatmul.mubr.msk.f32.vlgmr.msra.gmra.mrb[0].mxu0 %vm325_vm0, %v318_v8  ;;  %p918_p6 = pnand %p917_p2, %p911_p9 }
  0x8b   : > { %731 = vmatmul.mubr.msk.f32.vlgmr.msra.gmra.mrb[0].mxu1 %vm325_vm0, %v410_v9 }
 0x15d   : > { %v721_v11 = vpop.f32.mrb[0].mxu0 }
 0x15e   : > { %v732_v12 = vpop.f32.mrb[0].mxu1  ;;  %v404_v13 = vadd.f32 %v721_v11, %v682_v10  ;;  %v398_v15 = vpop.f32.mrb[1].mxu0 }
 0x15f   : > { %v489_v14 = vadd.f32 %v732_v12, %v682_v10  ;;  %v483_v16 = vpop.f32.mrb[1].mxu1  ;;  %v399_v17 = vadd.f32 %v682_v10, %v398_v15 }
 0x160   : > { %v484_v18 = vadd.f32 %v682_v10, %v483_v16  ;;  %408 = vst.msk [vmem:[%s300_s24 + $0x8] sm:$0xff] %vm325_vm0, %v404_v13 }
 0x161   : > { %493 = vst.msk [vmem:[%s307_s23 + $0x8] sm:$0xff] %vm325_vm0, %v489_v14  ;;  %407 = vst.msk [vmem:[%s300_s24] sm:$0xff] %vm325_vm0, %v399_v17 }
 0x162   : > { %492 = vst.msk [vmem:[%s307_s23] sm:$0xff] %vm325_vm0, %v484_v18 }
 0x163   : > { %921 = shalt.err (!%p918_p6)
}
 0x164   : > { %s922_s27 = scalar_lea.hbm %s1279_s11, 256  ;;  %s926_s23 = scalar_lea.hbm %s1366_s4, 512 }
 0x165   : > { %p923_p8 = scmp.ne.s32.totalorder %s1279_s11, %s922_s27  ;;  %p927_p4 = scmp.lt.u32.totalorder %s1279_s11, %s1366_s4 }
 0x166   : > { %p928_p11 = scmp.lt.u32.totalorder %s926_s23, %s922_s27  ;;  %p930_p3 = scmp.lt.u32.totalorder %s922_s27, %s1279_s11 }
 0x167   : > { %p924_p10 = pnand %p923_p8, %p1149_p12 }
 0x168   : > { %p929_p13 = por %p928_p11, %p927_p4 }
 0x169   : > { %p925_p0 = pneg %p924_p10 }
 0x16a   : > { %p931_p7 = por %p930_p3, %p929_p13 }
 0x16c   : > { %p932_p9 = pnand %p931_p7, %p925_p0 }
 0x16e   : > { %935 = shalt.err (!%p932_p9)
}
 0x16f   : > { %s1022_s16 = smov 128   ;;  %s1023_s10 = smov 8  }
 0x170   : > { %757 = dma.vmem_to_hbm [thread:$0]  (%p1149_p12), %s1272_s8, 256, %s1279_s11, %s495_s0, %s1022_s16, %s1022_s16, %s1023_s10  }
 0x171   : > { %s500_s2 = scalar_lea.sflag [#allocation10], %s1241_s20  ;;  %s936_s22 = scalar_lea.vmem %s1274_s13, 256 }
 0x172   : > { %p937_p1 = scmp.ne.s32.totalorder %s1274_s13, %s936_s22  ;;  %s1024_s28 = smov [#allocation9]  }
 0x173   : > { %s940_s12 = sshll.u32 %s1024_s28, 4  ;;  %s941_s12 = int_to_ptr.vmem [resolvable:$false] %s940_s12 }
 0x174   : > { %p938_p5 = pnand %p937_p1, %p1149_p12  ;;  %s942_s14 = scalar_lea.vmem %s941_s12, 512 }
 0x175   : > { %p943_p6 = scmp.lt.s32.totalorder %s1274_s13, %s941_s12  ;;  %p944_p8 = scmp.lt.s32.totalorder %s942_s14, %s936_s22 }
 0x176   : > { %p939_p2 = pneg %p938_p5 }
 0x177   : > { %p945_p10 = por %p944_p8, %p943_p6 }
 0x179   : > { %p946_p0 = pnand %p945_p10, %p939_p2 }
 0x17b   : > { %949 = shalt.err (!%p946_p0)
}
 0x17c   : > { %s950_s8 = scalar_lea.hbm %s1286_s7, 256  ;;  %s954_s15 = scalar_lea.hbm %s1367_s5, 512 }
 0x17d   : > { %p951_p4 = scmp.ne.s32.totalorder %s1286_s7, %s950_s8  ;;  %p955_p3 = scmp.lt.u32.totalorder %s1286_s7, %s1367_s5 }
 0x17e   : > { %p956_p7 = scmp.lt.u32.totalorder %s954_s15, %s950_s8  ;;  %p958_p1 = scmp.lt.u32.totalorder %s950_s8, %s1286_s7 }
 0x17f   : > { %p952_p11 = pnand %p951_p4, %p1149_p12 }
 0x180   : > { %p957_p9 = por %p956_p7, %p955_p3 }
 0x181   : > { %p953_p13 = pneg %p952_p11 }
 0x182   : > { %p959_p5 = por %p958_p1, %p957_p9 }
 0x184   : > { %p960_p2 = pnand %p959_p5, %p953_p13 }
 0x186   : > { %963 = shalt.err (!%p960_p2)
}
 0x187   : > { %758 = dma.vmem_to_hbm [thread:$0]  (%p1149_p12), %s1274_s13, 256, %s1286_s7, %s500_s2, %s1022_s16, %s1022_s16, %s1023_s10  }
 0x188 PF: > { %s544_s17 = sand.u32 1, %s1002_s18   ;;  %p1395_p6 = scmp.ne.s32.totalorder %s1380_s25, 0 }
 0x189   : > { %p1396_p8 = scmp.ge.s32.totalorder %s1014_s21, 2  ;;  %s545_s24 = scalar_lea.sflag [#allocation4], %s544_s17 }
 0x18b   : > { %p773_p10 = pnand %p1396_p8, %p1395_p6 }
 0x18d   : > { %993 = dma.done.wait (!%p773_p10), %s545_s24, 256  }
 0x18e   : > { %995 = vsyncadd (!%p773_p10), %s545_s24, 4294967040  ;;  %s554_s9 = scalar_lea.sflag [#allocation10], %s544_s17 }
 0x18f   : > { %997 = dma.done.wait (!%p773_p10), %s554_s9, 256  }
 0x190   : > { %999 = vsyncadd (!%p773_p10), %s554_s9, 4294967040  ;;  %s1397_s20 = sld [smem:[#allocation16_spill]]  ;;  %s1398_s23 = sld [smem:[#allocation17_spill]] }
 0x191   : > { %p25_p12 = scmp.ge.s32.totalorder %s1111_s30, 4   ;;  %s1399_s18 = smov %s1006_s19 }
 0x192   : > { %s1402_s21 = smov %s1111_s30 }
 0x193   :  { %27 = sbr.rel (!%p25_p12) target bundleno = 12 (0xc), region = 115 }
 0x196   : > { %s1400_s19 = smov %s1397_s20  ;;  %s1401_s20 = smov %s1398_s23 }
 0x19a   :  { %559 = vsyncpa [#allocation3], 1 }
 0x19b   :  { %561 = vsyncpa [#allocation3 + $0x1], 1 }
 0x19c   :  { %562 = vsyncpa [#allocation6], 1 }
 0x19d   :  { %564 = vsyncpa [#allocation6 + $0x1], 1 }
 0x19e   :  { %565 = vsyncpa [#allocation4], 1 }
 0x19f   :  { %567 = vsyncpa [#allocation4 + $0x1], 1 }
 0x1a0   :  { %568 = vsyncpa [#allocation10], 1 }
 0x1a1   :  { %570 = vsyncpa [#allocation10 + $0x1], 1 }

</bundles_post_ra>
